<compile_context>
chip_gen: v7x
topology: tpu7x:2x2x1
jax: 0.10.0
libtpu: 0.0.40
codegen_flags: <defaults>
</compile_context>

<pallas_src>
import functools

import jax
import jax.numpy as jnp
from jax.experimental import pallas as pl
from jax.experimental.pallas import tpu as pltpu

_LANE = 128            # vreg lane width
_MAX_TILE_ROWS = 512   # 512 x 128 f32 = 256 KiB per buffer


def _hash_u32(x):
    """lowbias32 integer finalizer: strong avalanche, pure 32-bit VPU ops."""
    x = x ^ (x >> 16)
    x = x * jnp.uint32(0x7FEB352D)
    x = x ^ (x >> 15)
    x = x * jnp.uint32(0x846CA68B)
    x = x ^ (x >> 16)
    return x


def _dropout_kernel(seed_ref, x_ref, o_ref, *, p, inv_keep, tile_rows):
    shape = x_ref.shape  # (tile_rows, 128)

    # Global linear element index of each slot in this tile (decorrelates tiles).
    row = jax.lax.broadcasted_iota(jnp.int32, shape, 0)
    col = jax.lax.broadcasted_iota(jnp.int32, shape, 1)
    base = pl.program_id(0) * tile_rows
    gidx = ((base + row) * _LANE + col).astype(jnp.uint32)

    # Counter-based PRNG: hash(index ^ scrambled_seed) -> 32 random bits / element.
    seed = seed_ref[0].astype(jnp.uint32) * jnp.uint32(0x9E3779B9)
    bits = _hash_u32(gidx ^ seed)

    # Top 24 bits -> uniform float in [0, 1).
    u = (bits >> 8).astype(jnp.int32).astype(jnp.float32) * (1.0 / 16777216.0)

    keep = (u > p).astype(jnp.float32)                    # matches torch: rand > p
    o_ref[...] = (
        x_ref[...].astype(jnp.float32) * (keep * inv_keep)  # multiply, never divide
    ).astype(o_ref.dtype)


def dropout_forward(x, p=0.5, seed=0, training=True):
    """Matches torch Dropout.forward: (rand > p).float() * x / (1 - p) when training."""
    if not training or p == 0.0:
        return x
    if p >= 1.0:
        return jnp.zeros_like(x)

    orig_shape = x.shape
    orig_dtype = x.dtype
    n = x.size

    rows = -(-n // _LANE)                 # ceil(n / 128)
    rows = ((rows + 7) // 8) * 8          # sublane multiple
    if rows > _MAX_TILE_ROWS:
        rows = ((rows + _MAX_TILE_ROWS - 1) // _MAX_TILE_ROWS) * _MAX_TILE_ROWS
        tile_rows = _MAX_TILE_ROWS
    else:
        tile_rows = rows
    num_tiles = rows // tile_rows

    x_flat = jnp.ravel(x)
    x_flat = jnp.pad(x_flat, (0, rows * _LANE - n))
    x2d = x_flat.reshape(rows, _LANE)
    seed_arr = jnp.asarray([seed], dtype=jnp.int32)

    kernel = functools.partial(
        _dropout_kernel,
        p=float(p),
        inv_keep=1.0 / (1.0 - float(p)),
        tile_rows=tile_rows,
    )

    out2d = pl.pallas_call(
        kernel,
        out_shape=jax.ShapeDtypeStruct((rows, _LANE), orig_dtype),
        grid_spec=pl.GridSpec(
            grid=(num_tiles,),
            in_specs=[
                pl.BlockSpec(memory_space=pltpu.MemorySpace.SMEM),      # seed scalar
                pl.BlockSpec((tile_rows, _LANE), lambda i: (i, 0)),     # x tile
            ],
            out_specs=pl.BlockSpec((tile_rows, _LANE), lambda i: (i, 0)),
        ),
        compiler_params=pltpu.CompilerParams(
            dimension_semantics=("parallel",),   # megacore-shardable on v7x
        ),
    )(seed_arr, x2d)

    return out2d.reshape(-1)[:n].reshape(orig_shape).astype(orig_dtype)


if __name__ == "__main__":
    # Small shape consistent with a conv-net Dropout: [B, C, H, W]
    B, C, H, W = 2, 4, 16, 16
    p = 0.5

    key = jax.random.PRNGKey(0)
    x = jax.random.normal(key, (B, C, H, W), dtype=jnp.float32)

    out = dropout_forward(x, p=p, seed=0, training=True)
    out = jax.block_until_ready(out)
    assert out.shape == x.shape

    # Every surviving element must equal x / (1 - p); dropped elements are exactly 0.
    scaled = x / (1.0 - p)
    ok = (out == 0.0) | (jnp.abs(out - scaled) <= 1e-5 * jnp.maximum(jnp.abs(scaled), 1.0))
    assert bool(jnp.all(ok)), "kept elements not scaled by 1/(1-p)"

    # Keep-rate should be close to (1 - p).
    keep_frac = float(jnp.mean((out != 0.0).astype(jnp.float32)))
    assert abs(keep_frac - (1.0 - p)) < 0.1, f"keep fraction {keep_frac} far from {1 - p}"

    # Same seed -> same mask (deterministic).
    out_again = jax.block_until_ready(dropout_forward(x, p=p, seed=0, training=True))
    assert bool(jnp.all(out == out_again)), "non-deterministic for fixed seed"

    # Eval mode is the identity (no kernel launch), matching the PyTorch module.
    out_eval = dropout_forward(x, p=p, seed=0, training=False)
    assert bool(jnp.all(out_eval == x))

    print("KERNEL_OK")
</pallas_src>

<mosaic_0001>
module attributes {stable_mosaic.version = 11 : i64} {
  func.func @_dropout_kernel(%arg0: i32, %arg1: memref<1xi32, #tpu.memory_space<smem>>, %arg2: memref<16x128xf32, #tpu.memory_space<vmem>>, %arg3: memref<16x128xf32, #tpu.memory_space<vmem>>) attributes {dimension_semantics = [#tpu.dimension_semantics<parallel>], iteration_bounds = array<i64: 1>, scalar_prefetch = 0 : i64, scratch_operands = 0 : i64, tpu.core_type = #tpu.core_type<tc>, window_params = [{transform_indices = @transform_0, window_bounds = array<i64: 1>}, {transform_indices = @transform_1, window_bounds = array<i64: 16, 128>}, {transform_indices = @transform_2, window_bounds = array<i64: 16, 128>}]} {
    %0 = tpu.iota {dimensions = array<i32: 0>} : vector<16x128xi32>
    %1 = tpu.iota {dimensions = array<i32: 1>} : vector<16x128xi32>
    %c16_i32 = arith.constant 16 : i32
    %2 = arith.muli %arg0, %c16_i32 : i32
    %3 = vector.broadcast %2 : i32 to vector<16x128xi32>
    %4 = arith.addi %3, %0 : vector<16x128xi32>
    %c128_i32 = arith.constant 128 : i32
    %5 = vector.broadcast %c128_i32 : i32 to vector<16x128xi32>
    %6 = arith.muli %4, %5 : vector<16x128xi32>
    %7 = arith.addi %6, %1 : vector<16x128xi32>
    %c0 = arith.constant 0 : index
    %8 = memref.load %arg1[%c0] : memref<1xi32, #tpu.memory_space<smem>>
    %c-1640531527_i32 = arith.constant -1640531527 : i32
    %9 = arith.muli %8, %c-1640531527_i32 : i32
    %10 = vector.broadcast %9 : i32 to vector<16x128xi32>
    %11 = arith.xori %7, %10 : vector<16x128xi32>
    %c16_i32_0 = arith.constant 16 : i32
    %12 = vector.broadcast %c16_i32_0 : i32 to vector<16x128xi32>
    %13 = arith.shrui %11, %12 : vector<16x128xi32>
    %14 = arith.xori %11, %13 : vector<16x128xi32>
    %c2146121005_i32 = arith.constant 2146121005 : i32
    %15 = vector.broadcast %c2146121005_i32 : i32 to vector<16x128xi32>
    %16 = arith.muli %14, %15 : vector<16x128xi32>
    %c15_i32 = arith.constant 15 : i32
    %17 = vector.broadcast %c15_i32 : i32 to vector<16x128xi32>
    %18 = arith.shrui %16, %17 : vector<16x128xi32>
    %19 = arith.xori %16, %18 : vector<16x128xi32>
    %c-2073254261_i32 = arith.constant -2073254261 : i32
    %20 = vector.broadcast %c-2073254261_i32 : i32 to vector<16x128xi32>
    %21 = arith.muli %19, %20 : vector<16x128xi32>
    %c16_i32_1 = arith.constant 16 : i32
    %22 = vector.broadcast %c16_i32_1 : i32 to vector<16x128xi32>
    %23 = arith.shrui %21, %22 : vector<16x128xi32>
    %24 = arith.xori %21, %23 : vector<16x128xi32>
    %c8_i32 = arith.constant 8 : i32
    %25 = vector.broadcast %c8_i32 : i32 to vector<16x128xi32>
    %26 = arith.shrui %24, %25 : vector<16x128xi32>
    %27 = arith.sitofp %26 : vector<16x128xi32> to vector<16x128xf32>
    %cst = arith.constant 5.96046448E-8 : f32
    %28 = vector.broadcast %cst : f32 to vector<16x128xf32>
    %29 = arith.mulf %27, %28 : vector<16x128xf32>
    %cst_2 = arith.constant 5.000000e-01 : f32
    %30 = vector.broadcast %cst_2 : f32 to vector<16x128xf32>
    %31 = arith.cmpf ogt, %29, %30 : vector<16x128xf32>
    %32 = arith.extui %31 : vector<16x128xi1> to vector<16x128xi32>
    %33 = arith.sitofp %32 : vector<16x128xi32> to vector<16x128xf32>
    %c0_3 = arith.constant 0 : index
    %c0_4 = arith.constant 0 : index
    %34 = vector.load %arg2[%c0_3, %c0_4] : memref<16x128xf32, #tpu.memory_space<vmem>>, vector<16x128xf32>
    %cst_5 = arith.constant 2.000000e+00 : f32
    %35 = vector.broadcast %cst_5 : f32 to vector<16x128xf32>
    %36 = arith.mulf %33, %35 : vector<16x128xf32>
    %37 = arith.mulf %34, %36 : vector<16x128xf32>
    %c0_6 = arith.constant 0 : index
    %c0_7 = arith.constant 0 : index
    %38 = vector.load %arg3[%c0_6, %c0_7] : memref<16x128xf32, #tpu.memory_space<vmem>>, vector<16x128xf32>
    tpu.vector_store %arg3[%c0_6, %c0_7], %37 {strides = array<i32>} : memref<16x128xf32, #tpu.memory_space<vmem>>, vector<16x128xf32>,
    return
  }
  func.func @transform_0(%arg0: i32) -> i32 {
    %c0_i32 = arith.constant 0 : i32
    %c0_i32_0 = arith.constant 0 : i32
    return %c0_i32 : i32
  }
  func.func @transform_1(%arg0: i32) -> (i32, i32) {
    %c0_i32 = arith.constant 0 : i32
    %c0_i32_0 = arith.constant 0 : i32
    return %arg0, %c0_i32 : i32, i32
  }
  func.func @transform_2(%arg0: i32) -> (i32, i32) {
    %c0_i32 = arith.constant 0 : i32
    %c0_i32_0 = arith.constant 0 : i32
    return %arg0, %c0_i32 : i32, i32
  }
}

</mosaic_0001>

<bundles_post_ra>
// kernel: tpu_custom_call.1
= control target key start
LH: loop header
LB: loop body
LE: loop exit
PB: predicated region body
PF: predicated region fallthrough
CT: control target
= control target key end

     0   :  { %8 = vsyncpa [#allocation4], 0  ;;  %s206_s0 = inlined_call_operand.<no memory space> [shape: s32[1], index: 0, kind: input, shape index: {}]   ;;  %s207_s1 = inlined_call_operand.hbm [shape: f32[16,128], index: 1, kind: input, shape index: {}]   ;;  %s208_s2 = inlined_call_operand.hbm [shape: f32[16,128], index: 2, kind: output, shape index: {}]  }
   0x1   :  { %9 = vsyncpa [#allocation5], 0  ;;  %s153_s9 = smov [#allocation3]   ;;  %s105_s13 = scalar_lea.hbm %s207_s1, 256 }
   0x2   :  { %s17_s10 = sshll.u32 %s153_s9, 4  ;;  %p106_p0 = scmp.ne.s32.totalorder %s207_s1, %s105_s13  ;;  %s18_s10 = int_to_ptr.vmem [resolvable:$true] %s17_s10 }
   0x3   :  { %p109_p1 = scmp.lt.u32.totalorder %s105_s13, %s207_s1 }
   0x5   :  { %p111_p2 = pnand %p109_p1, %p106_p0 }
   0x7   :  { %114 = shalt.err (!%p111_p2)
}
   0x8   :  { %s115_s18 = scalar_lea.vmem %s18_s10, 256  ;;  %p120_p4 = scmp.lt.s32.totalorder %s18_s10, %s18_s10 }
   0x9   :  { %p116_p3 = scmp.ne.s32.totalorder %s18_s10, %s115_s18  ;;  %p121_p5 = scmp.lt.s32.totalorder %s115_s18, %s115_s18 }
   0xb   :  { %p122_p6 = por %p121_p5, %p120_p4 }
   0xd   :  { %p123_p7 = pnand %p122_p6, %p116_p3 }
   0xf   :  { %126 = shalt.err (!%p123_p7)
}
  0x10   :  { %s154_s19 = smov 128   ;;  %s155_s20 = smov 8  }
  0x11   :  { %23 = dma.hbm_to_vmem [thread:$0]  %s207_s1, 256, %s18_s10, [#allocation4], %s154_s19, %s154_s19, %s155_s20  }
  0x12   :  { %149 = dma.done.wait [#allocation4], 256  }
  0x13   :  { %150 = vsyncadd [#allocation4], 4294967040  ;;  %v27_v0 = vlaneseq  ;;  %s41_s25 = smul.u32 2654435769, %s206_s0  ;;  %v156_v33 = vmov 0.0   ;;  %v73_v35 = vld [vmem:[#allocation3] sm:$0xff] }
  0x14   :  { %v74_v38 = vld [vmem:[#allocation3 + $0x8] sm:$0xff]  ;;  %s157_s0 = smov [#allocation6]  }
  0x15   :  { %v28_v1 = vshrl.u32 %v27_v0, 7  ;;  %v31_v2 = vand.u32 127, %v27_v0  ;;  %v42_v5 = vstv %s41_s25  ;;  %s86_s1 = sshll.u32 %s157_s0, 4  ;;  %s87_s1 = int_to_ptr.vmem [resolvable:$true] %s86_s1 }
  0x16   :  { %s127_s26 = scalar_lea.vmem %s87_s1, 256  ;;  %p132_p9 = scmp.lt.s32.totalorder %s87_s1, %s87_s1 }
  0x17   :  { %v36_v3 = vmul.u32 128, %v28_v1  ;;  %v29_v4 = vadd.s32 8, %v28_v1  ;;  %p128_p8 = scmp.ne.s32.totalorder %s87_s1, %s127_s26  ;;  %p133_p10 = scmp.lt.s32.totalorder %s127_s26, %s127_s26 }
  0x19   :  { %v38_v6 = vadd.s32 %v36_v3, %v31_v2  ;;  %v37_v7 = vmul.u32 128, %v29_v4  ;;  %p134_p11 = por %p133_p10, %p132_p9 }
  0x1b   :  { %v43_v8 = vxor.u32 %v42_v5, %v38_v6  ;;  %v39_v9 = vadd.s32 %v37_v7, %v31_v2  ;;  %p135_p12 = pnand %p134_p11, %p128_p8 }
  0x1d   :  { %v45_v10 = vshrl.u32 %v43_v8, 16  ;;  %v44_v11 = vxor.u32 %v42_v5, %v39_v9 }
  0x1f   :  { %v47_v12 = vxor.u32 %v45_v10, %v43_v8  ;;  %v46_v13 = vshrl.u32 %v44_v11, 16 }
  0x21   :  { %v49_v14 = vmul.u32 2146121005, %v47_v12  ;;  %v48_v15 = vxor.u32 %v46_v13, %v44_v11 }
  0x23   :  { %v51_v16 = vshrl.u32 %v49_v14, 15  ;;  %v50_v17 = vmul.u32 2146121005, %v48_v15 }
  0x25   :  { %v53_v18 = vxor.u32 %v51_v16, %v49_v14  ;;  %v52_v19 = vshrl.u32 %v50_v17, 15 }
  0x27   :  { %v55_v20 = vmul.u32 2221713035, %v53_v18  ;;  %v54_v21 = vxor.u32 %v52_v19, %v50_v17 }
  0x29   :  { %v57_v22 = vshrl.u32 %v55_v20, 16  ;;  %v56_v23 = vmul.u32 2221713035, %v54_v21 }
  0x2b   :  { %v59_v24 = vxor.u32 %v57_v22, %v55_v20  ;;  %v58_v25 = vshrl.u32 %v56_v23, 16 }
  0x2d   :  { %v61_v26 = vshrl.u32 %v59_v24, 8  ;;  %v60_v27 = vxor.u32 %v58_v25, %v56_v23 }
  0x2f   :  { %v63_v28 = vcvt.s32.f32 %v61_v26  ;;  %v62_v29 = vshrl.u32 %v60_v27, 8 }
  0x31   :  { %v65_v30 = vmul.f32 5.9604645e-08, %v63_v28  ;;  %v64_v31 = vcvt.s32.f32 %v62_v29 }
  0x33   :  { %vm67_vm0 = vcmp.gt.f32.partialorder %v65_v30, 0.5  ;;  %v66_v32 = vmul.f32 5.9604645e-08, %v64_v31 }
  0x34   :  { %v98_v34 = vsel %vm67_vm0, 1.0, %v156_v33 }
  0x35   :  { %v75_v36 = vmul.f32 2.0, %v98_v34  ;;  %vm68_vm1 = vcmp.gt.f32.partialorder %v66_v32, 0.5 }
  0x36   :  { %v99_v37 = vsel %vm68_vm1, 1.0, %v156_v33 }
  0x37   :  { %v77_v39 = vmul.f32 %v75_v36, %v73_v35  ;;  %v76_v40 = vmul.f32 2.0, %v99_v37 }
  0x39   :  { %79 = vst [vmem:[#allocation6] sm:$0xff] %v77_v39  ;;  %v78_v41 = vmul.f32 %v76_v40, %v74_v38 }
  0x3b   :  { %80 = vst [vmem:[#allocation6 + $0x8] sm:$0xff] %v78_v41 }
  0x3c   :  { %138 = shalt.err (!%p135_p12)
}
  0x3d   :  { %s139_s29 = scalar_lea.hbm %s208_s2, 256 }
  0x3e   :  { %p140_p13 = scmp.ne.s32.totalorder %s208_s2, %s139_s29  ;;  %p143_p0 = scmp.lt.u32.totalorder %s139_s29, %s208_s2 }
  0x40   :  { %p145_p1 = pnand %p143_p0, %p140_p13 }
  0x42   :  { %148 = shalt.err (!%p145_p1)
}
  0x43   :  { %92 = dma.vmem_to_hbm [thread:$0]  %s87_s1, 256, %s208_s2, [#allocation5], %s154_s19, %s154_s19, %s155_s20  }
  0x44   :  { %151 = dma.done.wait [#allocation5], 256  }
  0x45   :  { %152 = vsyncadd [#allocation5], 4294967040 }
  0x46   :  { %96 = vsyncpa [#allocation4], 1 }
  0x47   :  { %97 = vsyncpa [#allocation5], 1 }

</bundles_post_ra>
